<compile_context>
chip_gen: v6e
topology: v6e:2x2x1
jax: 0.10.0
libtpu: 0.0.40
codegen_flags: <defaults>
</compile_context>

<pallas_src>
import functools

import jax
import jax.numpy as jnp
from jax.experimental import pallas as pl
from jax.experimental.pallas import tpu as pltpu

EPS = 1e-5


def _unet_innermost_kernel(x_ref, wd_ref, wu_ref, g_ref, b_ref, o_ref,
                           sum_ref, sq_ref, scale_ref, shift_ref,
                           *, total_count):
    """Two-pass fused forward over a (pass, lane-tile) grid.

    Static shapes (per lane tile of width TL):
      x_ref : (4*Cin, TL)      space-to-depth input, rows ordered (ky, kx, c)
      wd_ref: (Cinner, 4*Cin)  Conv2d weight, cols ordered (ky, kx, c)
      wu_ref: (4*Cout, Cinner) ConvT weight, rows ordered (ky, kx, o)
      g_ref, b_ref: (Cout, 1)  BatchNorm affine params
      o_ref : (4*Cin + 4*Cout, TL)   [skip rows | up rows], contiguous blocks
      scratch: sum/sq/scale/shift all (4*Cout, 1) f32, persistent across grid
    """
    p = pl.program_id(0)          # 0 = stats pass, 1 = normalize/write pass
    j = pl.program_id(1)          # lane-tile index

    k_in = x_ref.shape[0]         # 4*Cin
    c_out = g_ref.shape[0]

    @pl.when(jnp.logical_and(p == 0, j == 0))
    def _init():
        sum_ref[...] = jnp.zeros_like(sum_ref)
        sq_ref[...] = jnp.zeros_like(sq_ref)

    # LeakyReLU(0.2) — applied in place to x by the PyTorch module, so the
    # skip connection carries LeakyReLU(x) as well.
    x = x_ref[...]
    h = jnp.where(x > 0, x, 0.2 * x)

    # Conv2d(k=2,s=2) and ConvTranspose2d(k=2,s=2) as MXU matmuls on the
    # space-to-depth layout (HIGHEST precision => exact-f32 multi-pass; the
    # MXU slot is otherwise idle, VALU/XLU stay free for the rest).
    hi = jax.lax.Precision.HIGHEST
    d = jnp.dot(wd_ref[...], h, preferred_element_type=jnp.float32, precision=hi)
    r = jnp.maximum(d, 0.0)
    u = jnp.dot(wu_ref[...], r, preferred_element_type=jnp.float32, precision=hi)

    @pl.when(p == 0)
    def _stats():
        # Single sweep over u: per-(tap,channel) sum and sum-of-squares.
        sum_ref[...] += jnp.sum(u, axis=1, keepdims=True)
        sq_ref[...] += jnp.sum(u * u, axis=1, keepdims=True)

    @pl.when(jnp.logical_and(p == 1, j == 0))
    def _finalize_stats():
        s4 = sum_ref[...]
        q4 = sq_ref[...]
        s = (s4[0 * c_out:1 * c_out] + s4[1 * c_out:2 * c_out]
             + s4[2 * c_out:3 * c_out] + s4[3 * c_out:4 * c_out])
        q = (q4[0 * c_out:1 * c_out] + q4[1 * c_out:2 * c_out]
             + q4[2 * c_out:3 * c_out] + q4[3 * c_out:4 * c_out])
        mu = s / total_count
        var = q / total_count - mu * mu          # one-pass variance
        inv = jax.lax.rsqrt(var + EPS)           # EUP
        sc = g_ref[...] * inv                    # (Cout, 1)
        sh = b_ref[...] - mu * sc                # (Cout, 1)
        # Broadcast once to all 4 taps so pass 1 is a single fused FMA + store.
        scale_ref[...] = jnp.concatenate([sc, sc, sc, sc], axis=0)
        shift_ref[...] = jnp.concatenate([sh, sh, sh, sh], axis=0)

    @pl.when(p == 1)
    def _write():
        # Contiguous [skip | up] row blocks -> two full-width unmasked stores.
        o_ref[0:k_in, :] = h
        o_ref[k_in:, :] = u * scale_ref[...] + shift_ref[...]


def _pick_lane_tile(p2, target):
    """Largest multiple-of-128 divisor of p2 that is <= target; full extent if
    p2 is not lane-aligned (block_shape == array dim is always legal)."""
    if p2 % 128 != 0:
        return p2
    tl = max(128, min(target - target % 128, p2))
    while p2 % tl != 0:
        tl -= 128
    return tl


def unet_innermost_forward(x, params, *, lane_tile_target=4096):
    """x: (N, Cin, H, W) f32.  params = (wd, wu, gamma, beta) with
       wd: (Cinner, Cin, 2, 2)   Conv2d weight (bias=False)
       wu: (Cinner, Cout, 2, 2)  ConvTranspose2d weight (bias=False)
       gamma, beta: (Cout,)      BatchNorm2d affine params.
       Returns (N, Cin + Cout, H, W)."""
    wd, wu, gamma, beta = params
    n, c_in, hh, ww = x.shape
    assert hh % 2 == 0 and ww % 2 == 0, "stride-2 UNet block needs even H, W"
    c_inner = wd.shape[0]
    c_out = wu.shape[1]
    h2, w2 = hh // 2, ww // 2
    p2 = n * h2 * w2
    k_in, k_out = 4 * c_in, 4 * c_out

    # space-to-depth (bijective relayout): rows (ky, kx, c), lanes (n, i, j)
    x_cols = (x.reshape(n, c_in, h2, 2, w2, 2)
                .transpose(3, 5, 1, 0, 2, 4)
                .reshape(k_in, p2))

    # Conv weight -> (Cinner, (ky,kx,c)); ConvT weight -> ((ky,kx,o), Cinner)
    wd_mat = wd.transpose(0, 2, 3, 1).reshape(c_inner, k_in)
    wu_mat = wu.transpose(2, 3, 1, 0).reshape(k_out, c_inner)

    tl = _pick_lane_tile(p2, lane_tile_target)
    n_tiles = p2 // tl

    kernel = functools.partial(_unet_innermost_kernel,
                               total_count=float(4 * p2))   # = N*H*W

    out_cols = pl.pallas_call(
        kernel,
        out_shape=jax.ShapeDtypeStruct((k_in + k_out, p2), jnp.float32),
        grid_spec=pltpu.PrefetchScalarGridSpec(
            num_scalar_prefetch=0,
            grid=(2, n_tiles),                               # (pass, lane tile)
            in_specs=[
                pl.BlockSpec((k_in, tl), lambda p, j: (0, j)),
                pl.BlockSpec((c_inner, k_in), lambda p, j: (0, 0)),
                pl.BlockSpec((k_out, c_inner), lambda p, j: (0, 0)),
                pl.BlockSpec((c_out, 1), lambda p, j: (0, 0)),
                pl.BlockSpec((c_out, 1), lambda p, j: (0, 0)),
            ],
            # Pass 0 never writes the output: park it on block 0 (no garbage
            # write-back); pass 1 walks the lane tiles.
            out_specs=pl.BlockSpec((k_in + k_out, tl), lambda p, j: (0, p * j)),
            scratch_shapes=[pltpu.VMEM((k_out, 1), jnp.float32)] * 4,
        ),
        compiler_params=pltpu.CompilerParams(
            dimension_semantics=("arbitrary", "arbitrary"),
            vmem_limit_bytes=32 * 1024 * 1024,
        ),
    )(x_cols, wd_mat, wu_mat, gamma.reshape(c_out, 1), beta.reshape(c_out, 1))

    # depth-to-space back to NCHW; contiguous [skip | up] blocks -> cheap
    # per-block relayout + channel concat.
    def _to_nchw(cols, c):
        return (cols.reshape(2, 2, c, n, h2, w2)
                    .transpose(3, 2, 4, 0, 5, 1)
                    .reshape(n, c, hh, ww))

    skip = _to_nchw(out_cols[:k_in], c_in)
    up = _to_nchw(out_cols[k_in:], c_out)
    return jnp.concatenate([skip, up], axis=1)


def _ref_forward(x, params):
    """Pure-JAX reference mirroring the PyTorch module's runtime semantics."""
    wd, wu, gamma, beta = params
    hi = jax.lax.Precision.HIGHEST
    h = jnp.where(x > 0, x, 0.2 * x)                       # in-place LeakyReLU
    d = jax.lax.conv_general_dilated(
        h, wd, window_strides=(2, 2), padding="VALID",
        dimension_numbers=("NCHW", "OIHW", "NCHW"), precision=hi)
    r = jnp.maximum(d, 0.0)
    n, _, h2, w2 = r.shape
    c_out = wu.shape[1]
    # ConvTranspose2d(k=2, s=2): y[n,o,2a+p,2b+q] = sum_i wu[i,o,p,q]*r[n,i,a,b]
    y = jnp.einsum("iopq,niab->noapbq", wu, r, precision=hi)
    y = y.reshape(n, c_out, 2 * h2, 2 * w2)
    mu = jnp.mean(y, axis=(0, 2, 3), keepdims=True)
    var = jnp.mean((y - mu) ** 2, axis=(0, 2, 3), keepdims=True)
    y = (gamma[None, :, None, None] * (y - mu) * jax.lax.rsqrt(var + EPS)
         + beta[None, :, None, None])
    return jnp.concatenate([h, y], axis=1)


if __name__ == "__main__":
    N, H, W = 2, 16, 16
    outer_nc = 4            # input_nc defaults to outer_nc in the module
    inner_nc = 8
    f32 = jnp.float32

    key = jax.random.PRNGKey(0)
    ks = jax.random.split(key, 5)
    wd = 0.3 * jax.random.normal(ks[0], (inner_nc, outer_nc, 2, 2), f32)  # downconv
    wu = 0.3 * jax.random.normal(ks[1], (inner_nc, outer_nc, 2, 2), f32)  # upconv (ConvT)
    gamma = 1.0 + 0.1 * jax.random.normal(ks[2], (outer_nc,), f32)
    beta = 0.1 * jax.random.normal(ks[3], (outer_nc,), f32)
    x = jax.random.normal(ks[4], (N, outer_nc, H, W), f32)
    params = (wd, wu, gamma, beta)

    out = jax.block_until_ready(jax.jit(unet_innermost_forward)(x, params))
    assert out.shape == (N, 2 * outer_nc, H, W), out.shape

    ref = jax.block_until_ready(jax.jit(_ref_forward)(x, params))
    max_err = float(jnp.max(jnp.abs(out - ref)))
    assert jnp.allclose(out, ref, atol=2e-3, rtol=2e-3), max_err

    print("KERNEL_OK")
</pallas_src>

<mosaic_0001>
module attributes {stable_mosaic.version = 11 : i64} {
  func.func @_unet_innermost_kernel(%arg0: i32, %arg1: i32, %arg2: memref<16x128xf32, #tpu.memory_space<vmem>>, %arg3: memref<8x16xf32, #tpu.memory_space<vmem>>, %arg4: memref<16x8xf32, #tpu.memory_space<vmem>>, %arg5: memref<4x1xf32, #tpu.memory_space<vmem>>, %arg6: memref<4x1xf32, #tpu.memory_space<vmem>>, %arg7: memref<32x128xf32, #tpu.memory_space<vmem>>, %arg8: memref<16x1xf32, #tpu.memory_space<vmem>>, %arg9: memref<16x1xf32, #tpu.memory_space<vmem>>, %arg10: memref<16x1xf32, #tpu.memory_space<vmem>>, %arg11: memref<16x1xf32, #tpu.memory_space<vmem>>) attributes {dimension_semantics = [#tpu.dimension_semantics<arbitrary>, #tpu.dimension_semantics<arbitrary>], iteration_bounds = array<i64: 2, 1>, scalar_prefetch = 0 : i64, scratch_operands = 4 : i64, tpu.core_type = #tpu.core_type<tc>, window_params = [{transform_indices = @transform_0, window_bounds = array<i64: 16, 128>}, {pipeline_mode = #tpu.pipeline_mode<synchronous>, transform_indices = @transform_1, window_bounds = array<i64: 8, 16>}, {pipeline_mode = #tpu.pipeline_mode<synchronous>, transform_indices = @transform_2, window_bounds = array<i64: 16, 8>}, {pipeline_mode = #tpu.pipeline_mode<synchronous>, transform_indices = @transform_3, window_bounds = array<i64: 4, 1>}, {pipeline_mode = #tpu.pipeline_mode<synchronous>, transform_indices = @transform_4, window_bounds = array<i64: 4, 1>}, {transform_indices = @transform_5, window_bounds = array<i64: 32, 128>}]} {
    %c0_i32 = arith.constant 0 : i32
    %0 = arith.cmpi eq, %arg0, %c0_i32 : i32
    %c0_i32_0 = arith.constant 0 : i32
    %1 = arith.cmpi eq, %arg1, %c0_i32_0 : i32
    %2 = arith.andi %0, %1 : i1
    %3 = arith.extui %2 : i1 to i32
    %c0_i32_1 = arith.constant 0 : i32
    %4 = arith.cmpi ne, %3, %c0_i32_1 : i32
    scf.if %4 {
      %cst_17 = arith.constant 0.000000e+00 : f32
      %28 = vector.broadcast %cst_17 : f32 to vector<16x1xf32>
      %c0_18 = arith.constant 0 : index
      %c0_19 = arith.constant 0 : index
      %29 = vector.load %arg8[%c0_18, %c0_19] : memref<16x1xf32, #tpu.memory_space<vmem>>, vector<16x1xf32>
      tpu.vector_store %arg8[%c0_18, %c0_19], %28 {strides = array<i32>} : memref<16x1xf32, #tpu.memory_space<vmem>>, vector<16x1xf32>,
      %cst_20 = arith.constant 0.000000e+00 : f32
      %30 = vector.broadcast %cst_20 : f32 to vector<16x1xf32>
      %c0_21 = arith.constant 0 : index
      %c0_22 = arith.constant 0 : index
      %31 = vector.load %arg9[%c0_21, %c0_22] : memref<16x1xf32, #tpu.memory_space<vmem>>, vector<16x1xf32>
      tpu.vector_store %arg9[%c0_21, %c0_22], %30 {strides = array<i32>} : memref<16x1xf32, #tpu.memory_space<vmem>>, vector<16x1xf32>,
    } else {
    }
    %c0 = arith.constant 0 : index
    %c0_2 = arith.constant 0 : index
    %5 = vector.load %arg2[%c0, %c0_2] : memref<16x128xf32, #tpu.memory_space<vmem>>, vector<16x128xf32>
    %cst = arith.constant 0.000000e+00 : f32
    %6 = vector.broadcast %cst : f32 to vector<16x128xf32>
    %7 = arith.cmpf ogt, %5, %6 : vector<16x128xf32>
    %cst_3 = arith.constant 2.000000e-01 : f32
    %8 = vector.broadcast %cst_3 : f32 to vector<16x128xf32>
    %9 = arith.mulf %8, %5 : vector<16x128xf32>
    %10 = arith.select %7, %5, %9 : vector<16x128xi1>, vector<16x128xf32>
    %c0_4 = arith.constant 0 : index
    %c0_5 = arith.constant 0 : index
    %11 = vector.load %arg3[%c0_4, %c0_5] : memref<8x16xf32, #tpu.memory_space<vmem>>, vector<8x16xf32>
    %cst_6 = arith.constant dense<0.000000e+00> : vector<8x128xf32>
    %12 = tpu.matmul %11, %10, %cst_6 {dimension_numbers = #tpu.dot_dimension_numbers<[1], [0], [0], [1], [0, 0, 1, 1], [], []>, precision = #tpu.contract_precision<fp32>} : vector<8x16xf32>, vector<16x128xf32>, vector<8x128xf32> -> vector<8x128xf32>
    %cst_7 = arith.constant 0.000000e+00 : f32
    %13 = vector.broadcast %cst_7 : f32 to vector<8x128xf32>
    %14 = arith.maximumf %12, %13 : vector<8x128xf32>
    %c0_8 = arith.constant 0 : index
    %c0_9 = arith.constant 0 : index
    %15 = vector.load %arg4[%c0_8, %c0_9] : memref<16x8xf32, #tpu.memory_space<vmem>>, vector<16x8xf32>
    %cst_10 = arith.constant dense<0.000000e+00> : vector<16x128xf32>
    %16 = tpu.matmul %15, %14, %cst_10 {dimension_numbers = #tpu.dot_dimension_numbers<[1], [0], [0], [1], [0, 0, 1, 1], [], []>, precision = #tpu.contract_precision<fp32>} : vector<16x8xf32>, vector<8x128xf32>, vector<16x128xf32> -> vector<16x128xf32>
    %c0_i32_11 = arith.constant 0 : i32
    %17 = arith.cmpi eq, %arg0, %c0_i32_11 : i32
    %18 = arith.extui %17 : i1 to i32
    %c0_i32_12 = arith.constant 0 : i32
    %19 = arith.cmpi ne, %18, %c0_i32_12 : i32
    scf.if %19 {
      %c0_17 = arith.constant 0 : index
      %c0_18 = arith.constant 0 : index
      %28 = vector.load %arg8[%c0_17, %c0_18] : memref<16x1xf32, #tpu.memory_space<vmem>>, vector<16x1xf32>
      %cst_19 = arith.constant dense<0.000000e+00> : vector<16xf32>
      %29 = vector.multi_reduction <add>, %16, %cst_19 [1] : vector<16x128xf32> to vector<16xf32>
      %30 = vector.shape_cast %29 : vector<16xf32> to vector<16x1xf32>
      %31 = arith.addf %28, %30 : vector<16x1xf32>
      %c0_20 = arith.constant 0 : index
      %c0_21 = arith.constant 0 : index
      %32 = vector.load %arg8[%c0_20, %c0_21] : memref<16x1xf32, #tpu.memory_space<vmem>>, vector<16x1xf32>
      tpu.vector_store %arg8[%c0_20, %c0_21], %31 {strides = array<i32>} : memref<16x1xf32, #tpu.memory_space<vmem>>, vector<16x1xf32>,
      %c0_22 = arith.constant 0 : index
      %c0_23 = arith.constant 0 : index
      %33 = vector.load %arg9[%c0_22, %c0_23] : memref<16x1xf32, #tpu.memory_space<vmem>>, vector<16x1xf32>
      %34 = arith.mulf %16, %16 : vector<16x128xf32>
      %cst_24 = arith.constant dense<0.000000e+00> : vector<16xf32>
      %35 = vector.multi_reduction <add>, %34, %cst_24 [1] : vector<16x128xf32> to vector<16xf32>
      %36 = vector.shape_cast %35 : vector<16xf32> to vector<16x1xf32>
      %37 = arith.addf %33, %36 : vector<16x1xf32>
      %c0_25 = arith.constant 0 : index
      %c0_26 = arith.constant 0 : index
      %38 = vector.load %arg9[%c0_25, %c0_26] : memref<16x1xf32, #tpu.memory_space<vmem>>, vector<16x1xf32>
      tpu.vector_store %arg9[%c0_25, %c0_26], %37 {strides = array<i32>} : memref<16x1xf32, #tpu.memory_space<vmem>>, vector<16x1xf32>,
    } else {
    }
    %c1_i32 = arith.constant 1 : i32
    %20 = arith.cmpi eq, %arg0, %c1_i32 : i32
    %c0_i32_13 = arith.constant 0 : i32
    %21 = arith.cmpi eq, %arg1, %c0_i32_13 : i32
    %22 = arith.andi %20, %21 : i1
    %23 = arith.extui %22 : i1 to i32
    %c0_i32_14 = arith.constant 0 : i32
    %24 = arith.cmpi ne, %23, %c0_i32_14 : i32
    scf.if %24 {
      %c0_17 = arith.constant 0 : index
      %c0_18 = arith.constant 0 : index
      %28 = vector.load %arg8[%c0_17, %c0_18] : memref<16x1xf32, #tpu.memory_space<vmem>>, vector<16x1xf32>
      %c0_19 = arith.constant 0 : index
      %c0_20 = arith.constant 0 : index
      %29 = vector.load %arg9[%c0_19, %c0_20] : memref<16x1xf32, #tpu.memory_space<vmem>>, vector<16x1xf32>
      %30 = vector.extract_strided_slice %28 {offsets = [0, 0], sizes = [4, 1], strides = [1, 1]} : vector<16x1xf32> to vector<4x1xf32>
      %31 = vector.extract_strided_slice %28 {offsets = [4, 0], sizes = [4, 1], strides = [1, 1]} : vector<16x1xf32> to vector<4x1xf32>
      %32 = arith.addf %30, %31 : vector<4x1xf32>
      %33 = vector.extract_strided_slice %28 {offsets = [8, 0], sizes = [4, 1], strides = [1, 1]} : vector<16x1xf32> to vector<4x1xf32>
      %34 = arith.addf %32, %33 : vector<4x1xf32>
      %35 = vector.extract_strided_slice %28 {offsets = [12, 0], sizes = [4, 1], strides = [1, 1]} : vector<16x1xf32> to vector<4x1xf32>
      %36 = arith.addf %34, %35 : vector<4x1xf32>
      %37 = vector.extract_strided_slice %29 {offsets = [0, 0], sizes = [4, 1], strides = [1, 1]} : vector<16x1xf32> to vector<4x1xf32>
      %38 = vector.extract_strided_slice %29 {offsets = [4, 0], sizes = [4, 1], strides = [1, 1]} : vector<16x1xf32> to vector<4x1xf32>
      %39 = arith.addf %37, %38 : vector<4x1xf32>
      %40 = vector.extract_strided_slice %29 {offsets = [8, 0], sizes = [4, 1], strides = [1, 1]} : vector<16x1xf32> to vector<4x1xf32>
      %41 = arith.addf %39, %40 : vector<4x1xf32>
      %42 = vector.extract_strided_slice %29 {offsets = [12, 0], sizes = [4, 1], strides = [1, 1]} : vector<16x1xf32> to vector<4x1xf32>
      %43 = arith.addf %41, %42 : vector<4x1xf32>
      %cst_21 = arith.constant 5.120000e+02 : f32
      %44 = vector.broadcast %cst_21 : f32 to vector<4x1xf32>
      %45 = arith.divf %36, %44 : vector<4x1xf32>
      %cst_22 = arith.constant 5.120000e+02 : f32
      %46 = vector.broadcast %cst_22 : f32 to vector<4x1xf32>
      %47 = arith.divf %43, %46 : vector<4x1xf32>
      %48 = arith.mulf %45, %45 : vector<4x1xf32>
      %49 = arith.subf %47, %48 : vector<4x1xf32>
      %cst_23 = arith.constant 9.99999974E-6 : f32
      %50 = vector.broadcast %cst_23 : f32 to vector<4x1xf32>
      %51 = arith.addf %49, %50 : vector<4x1xf32>
      %52 = math.rsqrt %51 : vector<4x1xf32>
      %c0_24 = arith.constant 0 : index
      %c0_25 = arith.constant 0 : index
      %53 = vector.load %arg5[%c0_24, %c0_25] : memref<4x1xf32, #tpu.memory_space<vmem>>, vector<4x1xf32>
      %54 = arith.mulf %53, %52 : vector<4x1xf32>
      %c0_26 = arith.constant 0 : index
      %c0_27 = arith.constant 0 : index
      %55 = vector.load %arg6[%c0_26, %c0_27] : memref<4x1xf32, #tpu.memory_space<vmem>>, vector<4x1xf32>
      %56 = arith.mulf %45, %54 : vector<4x1xf32>
      %57 = arith.subf %55, %56 : vector<4x1xf32>
      %58 = tpu.concatenate %54, %54, %54, %54 in 0 : vector<4x1xf32>, vector<4x1xf32>, vector<4x1xf32>, vector<4x1xf32> -> vector<16x1xf32>
      %c0_28 = arith.constant 0 : index
      %c0_29 = arith.constant 0 : index
      %59 = vector.load %arg10[%c0_28, %c0_29] : memref<16x1xf32, #tpu.memory_space<vmem>>, vector<16x1xf32>
      tpu.vector_store %arg10[%c0_28, %c0_29], %58 {strides = array<i32>} : memref<16x1xf32, #tpu.memory_space<vmem>>, vector<16x1xf32>,
      %60 = tpu.concatenate %57, %57, %57, %57 in 0 : vector<4x1xf32>, vector<4x1xf32>, vector<4x1xf32>, vector<4x1xf32> -> vector<16x1xf32>
      %c0_30 = arith.constant 0 : index
      %c0_31 = arith.constant 0 : index
      %61 = vector.load %arg11[%c0_30, %c0_31] : memref<16x1xf32, #tpu.memory_space<vmem>>, vector<16x1xf32>
      tpu.vector_store %arg11[%c0_30, %c0_31], %60 {strides = array<i32>} : memref<16x1xf32, #tpu.memory_space<vmem>>, vector<16x1xf32>,
    } else {
    }
    %c1_i32_15 = arith.constant 1 : i32
    %25 = arith.cmpi eq, %arg0, %c1_i32_15 : i32
    %26 = arith.extui %25 : i1 to i32
    %c0_i32_16 = arith.constant 0 : i32
    %27 = arith.cmpi ne, %26, %c0_i32_16 : i32
    scf.if %27 {
      %c0_17 = arith.constant 0 : index
      %c0_18 = arith.constant 0 : index
      %28 = vector.load %arg7[%c0_17, %c0_18] : memref<32x128xf32, #tpu.memory_space<vmem>>, vector<16x128xf32>
      tpu.vector_store %arg7[%c0_17, %c0_18], %10 {strides = array<i32>} : memref<32x128xf32, #tpu.memory_space<vmem>>, vector<16x128xf32>,
      %c0_19 = arith.constant 0 : index
      %c0_20 = arith.constant 0 : index
      %29 = vector.load %arg10[%c0_19, %c0_20] : memref<16x1xf32, #tpu.memory_space<vmem>>, vector<16x1xf32>
      %30 = vector.broadcast %29 : vector<16x1xf32> to vector<16x128xf32>
      %31 = arith.mulf %16, %30 : vector<16x128xf32>
      %c0_21 = arith.constant 0 : index
      %c0_22 = arith.constant 0 : index
      %32 = vector.load %arg11[%c0_21, %c0_22] : memref<16x1xf32, #tpu.memory_space<vmem>>, vector<16x1xf32>
      %33 = vector.broadcast %32 : vector<16x1xf32> to vector<16x128xf32>
      %34 = arith.addf %31, %33 : vector<16x128xf32>
      %c16 = arith.constant 16 : index
      %c0_23 = arith.constant 0 : index
      %35 = vector.load %arg7[%c16, %c0_23] : memref<32x128xf32, #tpu.memory_space<vmem>>, vector<16x128xf32>
      tpu.vector_store %arg7[%c16, %c0_23], %34 {strides = array<i32>} : memref<32x128xf32, #tpu.memory_space<vmem>>, vector<16x128xf32>,
    } else {
    }
    return
  }
  func.func @transform_0(%arg0: i32, %arg1: i32) -> (i32, i32) {
    %c0_i32 = arith.constant 0 : i32
    %c0_i32_0 = arith.constant 0 : i32
    return %c0_i32, %arg1 : i32, i32
  }
  func.func @transform_1(%arg0: i32, %arg1: i32) -> (i32, i32) {
    %c0_i32 = arith.constant 0 : i32
    %c0_i32_0 = arith.constant 0 : i32
    %c0_i32_1 = arith.constant 0 : i32
    return %c0_i32, %c0_i32_0 : i32, i32
  }
  func.func @transform_2(%arg0: i32, %arg1: i32) -> (i32, i32) {
    %c0_i32 = arith.constant 0 : i32
    %c0_i32_0 = arith.constant 0 : i32
    %c0_i32_1 = arith.constant 0 : i32
    return %c0_i32, %c0_i32_0 : i32, i32
  }
  func.func @transform_3(%arg0: i32, %arg1: i32) -> (i32, i32) {
    %c0_i32 = arith.constant 0 : i32
    %c0_i32_0 = arith.constant 0 : i32
    %c0_i32_1 = arith.constant 0 : i32
    return %c0_i32, %c0_i32_0 : i32, i32
  }
  func.func @transform_4(%arg0: i32, %arg1: i32) -> (i32, i32) {
    %c0_i32 = arith.constant 0 : i32
    %c0_i32_0 = arith.constant 0 : i32
    %c0_i32_1 = arith.constant 0 : i32
    return %c0_i32, %c0_i32_0 : i32, i32
  }
  func.func @transform_5(%arg0: i32, %arg1: i32) -> (i32, i32) {
    %0 = arith.muli %arg0, %arg1 : i32
    %c0_i32 = arith.constant 0 : i32
    %c0_i32_0 = arith.constant 0 : i32
    return %c0_i32, %0 : i32, i32
  }
}

</mosaic_0001>

<bundles_post_ra>
// kernel: unet_innermost_forward.1
= control target key start
LH: loop header
LB: loop body
LE: loop exit
PB: predicated region body
PF: predicated region fallthrough
CT: control target
= control target key end

     0   :  { %s1614_s18 = smov 0   ;;  %s1616_s19 = smov 0   ;;  %s1708_s0 = inlined_call_operand.vmem [shape: f32[16,128], index: 0, kind: input, shape index: {}]   ;;  %s1709_s1 = inlined_call_operand.vmem [shape: f32[8,16], index: 1, kind: input, shape index: {}]   ;;  %s1710_s2 = inlined_call_operand.vmem [shape: f32[16,8], index: 2, kind: input, shape index: {}]   ;;  %s1711_s3 = inlined_call_operand.vmem [shape: f32[4,1], index: 3, kind: input, shape index: {}]   ;;  %s1712_s4 = inlined_call_operand.vmem [shape: f32[4,1], index: 4, kind: input, shape index: {}]   ;;  %s1713_s5 = inlined_call_operand.vmem [shape: f32[32,128], index: 5, kind: output, shape index: {}]  }
   0x1   :  { %s1618_s20 = smov 0  }
   0x2 LB: > { %s27_s21 = sadd.s32 1, %s1574_s19  ;;  %p1405_p0 = scmp.ge.s32.totalorder %s1578_s20, 1  ;;  %s1578_s20 = sphi %s1618_s20, %s15_s20   ;;  %s1574_s19 = sphi %s1616_s19, %s1715_s19   ;;  %s1570_s18 = sphi %s1614_s18, %s1714_s18  }
   0x3   : > { %p29_p1 = scmp.ge.s32.totalorder %s27_s21, 2  ;;  %p200_p2 = scmp.lt.s32.totalorder %s1578_s20, 3 }
   0x5   : > { %s1717_s21 = smov (%p29_p1, %s27_s21), 0  ;;  %p201_p3 = pnand %p1405_p0, %p200_p2 }
   0x6   : > { %p237_p4 = scmp.eq.s32.totalorder (!%p201_p3), %s1570_s18, 0 }
   0x7   : > { %204 = sbr.rel (%p201_p3) target bundleno = 790 (0x316), region = 40 }
   0xc   : > { %242 = sbr.rel (!%p237_p4) target bundleno = 17 (0x11), region = 44  ;;  %vm243_vm0 = vcmask (%p237_p4), 7168   ;;  %v1580_v0 = vmov (%p237_p4), 0.0  }
   0xd   : > { %244 = vst.msk [vmem:[#allocation2] sm:$0xff] (%p237_p4), %vm243_vm0, %v1580_v0  ;;  %245 = vst.msk [vmem:[#allocation2 + $0x8] sm:$0xff] (%p237_p4), %vm243_vm0, %v1580_v0 }
   0xe   : > { %246 = vst.msk [vmem:[#allocation3] sm:$0xff] (%p237_p4), %vm243_vm0, %v1580_v0  ;;  %247 = vst.msk [vmem:[#allocation3 + $0x8] sm:$0xff] (%p237_p4), %vm243_vm0, %v1580_v0 }
  0x11 PF: > { %v249_v1 = vld [vmem:[%s1708_s0 + $0x8] sm:$0xff]  ;;  %v248_v2 = vld [vmem:[%s1708_s0] sm:$0xff]  ;;  %vm257_vm1 = vcmask 130048   ;;  %v1581_v4 = vmov 0.0   ;;  %vm1582_vm4 = vmmov 0   ;;  %vm723_vm5 = vcmask 64512  }
  0x12   : > { %v256_v3 = vld [vmem:[%s1709_s1] sm:$0xff]  ;;  %1452 = vmatprep.subr.mxu0 %v1581_v4  ;;  %vm251_vm2 = vcmp.gt.f32.partialorder %v249_v1, 0.0  ;;  %v253_v5 = vmul.f32 0.2, %v249_v1  ;;  %vm250_vm3 = vcmp.gt.f32.partialorder %v248_v2, 0.0  ;;  %1456 = vmatprep.mubr.msk.f32.mxu0 %vm1582_vm4, %v1581_v4  ;;  %v722_v32 = vld [vmem:[%s1710_s2 + $0x8] sm:$0xff] }
  0x13   : > { %v252_v6 = vmul.f32 0.2, %v248_v2  ;;  %v259_v7 = vsel %vm257_vm1, %v256_v3, 0  ;;  %1459 = vmatprep.subr.mxu1 %v1581_v4  ;;  %1463 = vmatprep.mubr.msk.f32.mxu1 %vm1582_vm4, %v1581_v4  ;;  %v721_v25 = vld [vmem:[%s1710_s2] sm:$0xff]  ;;  %v728_v34 = vsel %vm723_vm5, %v722_v32, 0  ;;  %p1407_p5 = scmp.ne.s32.totalorder %s1570_s18, 0 }
  0x14   : > { %v1646_v8 = vsel %vm251_vm2, %v249_v1, %v253_v5  ;;  %v328_v10 = vand.u32 4294901760, %v259_v7  ;;  %v725_v26 = vsel %vm723_vm5, %v721_v25, 0  ;;  %v806_v37 = vand.u32 4294901760, %v728_v34 }
  0x15   : > { %v1648_v9 = vsel %vm250_vm3, %v248_v2, %v252_v6  ;;  %v290_v11 = vand.u32 4294901760, %v1646_v8  ;;  %v796_v27 = vand.u32 4294901760, %v725_v26 }
  0x16   : > { %v293_v12 = vand.u32 4294901760, %v1648_v9  ;;  %v329_v13 = vsub.f32 %v259_v7, %v328_v10  ;;  %v807_v43 = vsub.f32 %v728_v34, %v806_v37 }
  0x17   : > { %1453 = vmatpush3.msra.mxu0 %v290_v11  ;;  %v368_v14 = vsub.f32 %v1646_v8, %v290_v11  ;;  %v797_v28 = vsub.f32 %v725_v26, %v796_v27 }
  0x18   : > { %v375_v15 = vsub.f32 %v1648_v9, %v293_v12  ;;  %1454 = vmatprep.subr.mxu0 %v1581_v4  ;;  %v330_v16 = vand.u32 4294901760, %v329_v13  ;;  %v808_v48 = vand.u32 4294901760, %v807_v43 }
  0x19   : > { %1455 = vmatpush3.msra.mxu0 %v293_v12  ;;  %v369_v17 = vand.u32 4294901760, %v368_v14  ;;  %v798_v29 = vand.u32 4294901760, %v797_v28 }
  0x1a   : > { %v376_v18 = vand.u32 4294901760, %v375_v15  ;;  %v331_v19 = vsub.f32 %v329_v13, %v330_v16  ;;  %1466 = vmatprep.subr.mxu0 %v1581_v4  ;;  %v809_v53 = vsub.f32 %v807_v43, %v808_v48 }
  0x1b   : > { %v370_v20 = vsub.f32 %v368_v14, %v369_v17  ;;  %v799_v30 = vsub.f32 %v797_v28, %v798_v29 }
  0x1c   : > { %v377_v21 = vsub.f32 %v375_v15, %v376_v18  ;;  %v332_v22 = vand.u32 4294901760, %v331_v19  ;;  %v810_v57 = vand.u32 4294901760, %v809_v53 }
  0x1d   : > { %v371_v23 = vand.u32 4294901760, %v370_v20  ;;  %v800_v31 = vand.u32 4294901760, %v799_v30 }
  0x1e   : > { %v378_v24 = vand.u32 4294901760, %v377_v21  ;;  %1457 = vmatmul.mubr.f32.vlgmr.msra.gmra.mxu0 %v332_v22 }
  0x1f   : > { %1460 = vmatpush3.msra.mxu1 %v371_v23  ;;  %1467 = vmatpush3.msra.mxu0 %v368_v14 }
  0x20   : > { %1461 = vmatprep.subr.mxu1 %v1581_v4  ;;  %1468 = vmatprep.subr.mxu0 %v1581_v4 }
  0x21   : > { %1462 = vmatpush3.msra.mxu1 %v378_v24  ;;  %1469 = vmatpush3.msra.mxu0 %v375_v15 }
  0x22   : > { %1470 = vmatprep.mubr.msk.f32.mxu0 %vm1582_vm4, %v1581_v4  ;;  %1464 = vmatmul.mubr.f32.vlgmr.msra.gmra.mxu1 %v328_v10 }
  0x23   : > { %1471 = vmatmul.mubr.f32.vlgmr.msra.gmra.mxu0 %v329_v13  ;;  %1473 = vmatprep.subr.mxu1 %v1581_v4 }
  0x24   : > { %1480 = vmatprep.subr.mxu0 %v1581_v4  ;;  %1474 = vmatpush3.msra.mxu1 %v290_v11 }
  0x25   : > { %1481 = vmatpush3.msra.mxu0 %v369_v17  ;;  %1475 = vmatprep.subr.mxu1 %v1581_v4 }
  0x26   : > { %1482 = vmatprep.subr.mxu0 %v1581_v4  ;;  %1476 = vmatpush3.msra.mxu1 %v293_v12 }
  0x27   : > { %1477 = vmatprep.mubr.msk.f32.mxu1 %vm1582_vm4, %v1581_v4  ;;  %1483 = vmatpush3.msra.mxu0 %v376_v18 }
  0x28   : > { %1484 = vmatprep.mubr.msk.f32.mxu0 %vm1582_vm4, %v1581_v4  ;;  %1478 = vmatmul.mubr.f32.vlgmr.msra.gmra.mxu1 %v330_v16 }
  0x29   : > { %1485 = vmatmul.mubr.f32.vlgmr.msra.gmra.mxu0 %v328_v10  ;;  %1487 = vmatprep.subr.mxu1 %v1581_v4 }
  0x2a   : > { %1488 = vmatpush3.msra.mxu1 %v290_v11  ;;  %1491 = vmatprep.mubr.msk.f32.mxu1 %vm1582_vm4, %v1581_v4 }
  0x2b   : > { %1489 = vmatprep.subr.mxu1 %v1581_v4  ;;  %1496 = vmatprep.mubr.f32.mxu0 %v800_v31 }
  0x2c   : > { %1490 = vmatpush3.msra.mxu1 %v293_v12 }
  0x2d   : > { %1492 = vmatmul.mubr.f32.vlgmr.msra.gmra.mxu1 %v328_v10 }
  0x2e   : > { %1501 = vmatprep.mubr.f32.mxu1 %v796_v27 }
  0xde   : > { %v334_v33 = vpop.f32.mrf.mxu0 }
  0xe0   : > { %v1458_v35 = vpop.f32.mrf.mxu0 }
  0xe2   : > { %v415_v36 = vpop.f32.mrf.mxu1 }
  0xe3   : > { %v416_v38 = vadd.f32 %v415_v36, %v334_v33  ;;  %v491_v39 = vpop.f32.mrf.mxu0 }
  0xe4   : > { %v1465_v40 = vpop.f32.mrf.mxu1 }
  0xe5   : > { %v492_v41 = vadd.f32 %v491_v39, %v416_v38  ;;  %v1472_v42 = vpop.f32.mrf.mxu0 }
  0xe8   : > { %v566_v44 = vpop.f32.mrf.mxu1 }
  0xe9   : > { %v567_v45 = vadd.f32 %v566_v44, %v492_v41  ;;  %v643_v46 = vpop.f32.mrf.mxu0 }
  0xea   : > { %v1479_v47 = vpop.f32.mrf.mxu1 }
  0xeb   : > { %v644_v49 = vadd.f32 %v643_v46, %v567_v45  ;;  %v1486_v50 = vpop.f32.mrf.mxu0 }
  0xed   : > { %v716_v51 = vpop.f32.mrf.mxu1 }
  0xee   : > { %v717_v52 = vadd.f32 %v716_v51, %v644_v49 }
  0xef   : > { %v1493_v54 = vpop.f32.mrf.mxu1 }
  0xf0   : > { %v720_v55 = vmax.f32 %v717_v52, 0.0 }
  0xf2   : > { %v761_v56 = vand.u32 4294901760, %v720_v55 }
  0xf4   : > { %v848_v58 = vsub.f32 %v720_v55, %v761_v56  ;;  %1494 = vmatprep.subr.mxu0 %v761_v56 }
  0xf5   : > { %1495 = vmatpush3.msra.mxu0 %v761_v56 }
  0xf6   : > { %1497 = vmatmul.mubr.f32.vlgmr.msra.gmra.mxu0 %v810_v57  ;;  %1504 = vmatprep.subr.mxu0 %v848_v58  ;;  %v849_v59 = vand.u32 4294901760, %v848_v58 }
  0xf7   : > { %1505 = vmatpush3.msra.mxu0 %v848_v58  ;;  %1506 = vmatprep.mubr.f32.mxu0 %v797_v28 }
  0xf8   : > { %1514 = vmatprep.subr.mxu0 %v849_v59  ;;  %v850_v60 = vsub.f32 %v848_v58, %v849_v59 }
  0xfa   : > { %1507 = vmatmul.mubr.f32.vlgmr.msra.gmra.mxu0 %v807_v43  ;;  %v851_v61 = vand.u32 4294901760, %v850_v60 }
  0xfb   : > { %1515 = vmatpush3.msra.mxu0 %v849_v59  ;;  %1516 = vmatprep.mubr.f32.mxu0 %v796_v27 }
  0xfc   : > { %1499 = vmatprep.subr.mxu1 %v851_v61 }
  0xfd   : > { %1500 = vmatpush3.msra.mxu1 %v851_v61 }
  0xfe   : > { %1502 = vmatmul.mubr.f32.vlgmr.msra.gmra.mxu1 %v806_v37  ;;  %1509 = vmatprep.subr.mxu1 %v761_v56 }
  0xff   : > { %1510 = vmatpush3.msra.mxu1 %v761_v56  ;;  %1511 = vmatprep.mubr.f32.mxu1 %v798_v29 }
 0x100   : > { %1519 = vmatprep.subr.mxu1 %v761_v56  ;;  %1517 = vmatmul.mubr.f32.vlgmr.msra.gmra.mxu0 %v806_v37 }
 0x102   : > { %1512 = vmatmul.mubr.f32.vlgmr.msra.gmra.mxu1 %v808_v48 }
 0x103   : > { %1520 = vmatpush3.msra.mxu1 %v761_v56  ;;  %1521 = vmatprep.mubr.f32.mxu1 %v796_v27 }
 0x106   : > { %1522 = vmatmul.mubr.f32.vlgmr.msra.gmra.mxu1 %v806_v37 }
 0x1b6   : > { %v1498_v62 = vpop.f32.mrf.mxu0 }
 0x1b8   : > { %v802_v63 = vpop.f32.mrf.mxu0 }
 0x1ba   : > { %v1508_v0 = vpop.f32.mrf.mxu0 }
 0x1bc   : > { %v968_v2 = vpop.f32.mrf.mxu0 }
 0x1be   : > { %v1503_v1 = vpop.f32.mrf.mxu1 }
 0x1bf   : > { %v895_v3 = vadd.f32 %v1503_v1, %v1498_v62 }
 0x1c0   : > { %v888_v4 = vpop.f32.mrf.mxu1  ;;  %v1518_v10 = vpop.f32.mrf.mxu0 }
 0x1c1   : > { %v889_v5 = vadd.f32 %v888_v4, %v802_v63  ;;  %v976_v6 = vadd.f32 %v1508_v0, %v895_v3 }
 0x1c2   : > { %v1513_v7 = vpop.f32.mrf.mxu1  ;;  %v1131_v16 = vpop.f32.mrf.mxu0 }
 0x1c3   : > { %v969_v11 = vadd.f32 %v968_v2, %v889_v5  ;;  %v1058_v12 = vadd.f32 %v1513_v7, %v976_v6 }
 0x1c4   : > { %v1049_v13 = vpop.f32.mrf.mxu1 }
 0x1c5   : > { %v1050_v14 = vadd.f32 %v1049_v13, %v969_v11  ;;  %v1138_v15 = vadd.f32 %v1518_v10, %v1058_v12  ;;  %1221 = sbr.rel (%p1407_p5) target bundleno = 606 (0x25e), region = 48 }
 0x1c6   : > { %v1523_v17 = vpop.f32.mrf.mxu1 }
 0x1c7   : > { %v1132_v18 = vadd.f32 %v1131_v16, %v1050_v14  ;;  %v1664_v19 = vadd.f32 %v1523_v17, %v1138_v15 }
 0x1c8   : > { %v1209_v20 = vpop.f32.mrf.mxu1 }
 0x1c9   : > { %v1666_v21 = vadd.f32 %v1209_v20, %v1132_v18 }
 0x1ca   : > { %v1236_v23 = vmul.f32 %v1664_v19, %v1664_v19  ;;  %v1222_v24 = vld [vmem:[#allocation2] sm:$0xff]  ;;  %vm1230_vm6 = vcmask 7168   ;;  %v1233_v26 = vld [vmem:[#allocation3] sm:$0xff]  ;;  %v1223_v29 = vld [vmem:[#allocation2 + $0x8] sm:$0xff] }
 0x1cb   : > { %1224 = vadd.xlane.f32.xlu0 %v1666_v21  ;;  %v1235_v22 = vmul.f32 %v1666_v21, %v1666_v21  ;;  %v1234_v32 = vld [vmem:[#allocation3 + $0x8] sm:$0xff] }
 0x1cd   : > { %1237 = vadd.xlane.f32.xlu1 %v1235_v22 }
 0x1cf   : > { %1226 = vadd.xlane.f32.xlu0 %v1664_v19 }
 0x1d1   : > { %1239 = vadd.xlane.f32.xlu1 %v1236_v23 }
 0x254   : > { %v1225_v25 = vpop.xlane.xlu0 %1224 }
 0x255   : > { %v1228_v27 = vadd.f32 %v1225_v25, %v1222_v24 }
 0x256   : > { %v1238_v28 = vpop.xlane.xlu1 %1237 }
 0x257   : > { %1231 = vst.msk [vmem:[#allocation2] sm:$0xff] %vm1230_vm6, %v1228_v27  ;;  %v1241_v30 = vadd.f32 %v1238_v28, %v1233_v26 }
 0x258   : > { %v1227_v31 = vpop.xlane.xlu0 %1226 }
 0x259   : > { %1243 = vst.msk [vmem:[#allocation3] sm:$0xff] %vm1230_vm6, %v1241_v30  ;;  %v1229_v33 = vadd.f32 %v1227_v31, %v1223_v29 }
 0x25a   : > { %v1240_v34 = vpop.xlane.xlu1 %1239 }
 0x25b   : > { %1232 = vst.msk [vmem:[#allocation2 + $0x8] sm:$0xff] %vm1230_vm6, %v1229_v33  ;;  %v1242_v35 = vadd.f32 %v1240_v34, %v1234_v32 }
 0x25d   : > { %1244 = vst.msk [vmem:[#allocation3 + $0x8] sm:$0xff] %vm1230_vm6, %v1242_v35 }
 0x25e PF: > { %p1245_p6 = scmp.eq.s32.totalorder %s1570_s18, 1 }
 0x25f   : > { %v1250_v36 = vld [vmem:[#allocation2] sm:$0xff] (%p1245_p6)  ;;  %vm1287_vm7 = vcmask (%p1245_p6), 1043456   ;;  %vm1289_vm8 = vcmask (%p1245_p6), 7168  }
 0x260   : > { %1249 = sbr.rel (!%p1245_p6) target bundleno = 648 (0x288), region = 52  ;;  %v1252_v38 = vld [vmem:[#allocation3] sm:$0xff] (%p1245_p6)  ;;  %v1255_v40 = vrot.slane (%p1245_p6), %v1250_v36, 4  ;;  %v1279_v55 = vld [vmem:[%s1711_s3] sm:$0xf] (%p1245_p6) }
 0x261   : > { %v1264_v41 = vrot.slane (%p1245_p6), %v1252_v38, 4  ;;  %v1281_v58 = vld [vmem:[%s1712_s4] sm:$0xf] (%p1245_p6) }
 0x262   : > { %v1251_v37 = vld [vmem:[#allocation2 + $0x8] sm:$0xff] (%p1245_p6)  ;;  %v1257_v42 = vadd.f32 (%p1245_p6), %v1255_v40, %v1250_v36 }
 0x263   : > { %v1260_v43 = vrot.slane (%p1245_p6), %v1251_v37, 4  ;;  %v1266_v44 = vadd.f32 (%p1245_p6), %v1264_v41, %v1252_v38 }
 0x264   : > { %v1253_v39 = vld [vmem:[#allocation3 + $0x8] sm:$0xff] (%p1245_p6)  ;;  %v1258_v46 = vadd.f32 (%p1245_p6), %v1257_v42, %v1251_v37 }
 0x265   : > { %v1269_v45 = vrot.slane %v1253_v39, 4  ;;  %v1267_v47 = vadd.f32 %v1266_v44, %v1253_v39 }
 0x266   : > { %v1262_v48 = vadd.f32 %v1260_v43, %v1258_v46 }
 0x267   : > { %v1271_v49 = vadd.f32 %v1269_v45, %v1267_v47 }
 0x268   : > { %v1273_v50 = vmul.f32 0.001953125, %v1262_v48 }
 0x269   : > { %v1274_v51 = vmul.f32 0.001953125, %v1271_v49 }
 0x26a   : > { %v1275_v52 = vmul.f32 %v1273_v50, %v1273_v50 }
 0x26c   : > { %v1276_v53 = vsub.f32 %v1274_v51, %v1275_v52 }
 0x26e   : > { %v1277_v54 = vadd.f32 1e-05, %v1276_v53 }
 0x270   : > { %1552 = vrsqrt.f32 %v1277_v54 }
 0x27d   : > { %v1553_v56 = vpop.eup %1552 }
 0x27e   : > { %v1280_v57 = vmul.f32 %v1553_v56, %v1279_v55 }
 0x280   : > { %v1285_v59 = vrot.slane %v1280_v57, 4  ;;  %v1282_v60 = vmul.f32 %v1280_v57, %v1273_v50 }
 0x282   : > { %v1288_v61 = vsel %vm1287_vm7, %v1280_v57, %v1285_v59  ;;  %v1283_v62 = vsub.f32 %v1281_v58, %v1282_v60 }
 0x283   : > { %1290 = vst.msk [vmem:[#allocation4] sm:$0xff] %vm1289_vm8, %v1288_v61  ;;  %1291 = vst.msk [vmem:[#allocation4 + $0x8] sm:$0xff] %vm1289_vm8, %v1288_v61 }
 0x284   : > { %v1293_v63 = vrot.slane %v1283_v62, 4 }
 0x286   : > { %v1295_v0 = vsel %vm1287_vm7, %v1283_v62, %v1293_v63 }
 0x287   : > { %1296 = vst.msk [vmem:[#allocation5] sm:$0xff] %vm1289_vm8, %v1295_v0  ;;  %1297 = vst.msk [vmem:[#allocation5 + $0x8] sm:$0xff] %vm1289_vm8, %v1295_v0 }
 0x288 PF: > { %p1409_p7 = scmp.ne.s32.totalorder %s1570_s18, 1 }
 0x28a   : > { %1300 = sbr.rel (%p1409_p7) target bundleno = 790 (0x316), region = 56 }
 0x28f   : > { %v1317_v1 = vld [vmem:[#allocation5] sm:$0xff]  ;;  %v1303_v2 = vld [vmem:[#allocation4] sm:$0xff]  ;;  %1301 = vst [vmem:[%s1713_s5] sm:$0xff] %v1648_v9  ;;  %1302 = vst [vmem:[%s1713_s5 + $0x8] sm:$0xff] %v1646_v8  ;;  %v1583_v3 = vmov 0  }
 0x290   : > { %1555 = vset.pattern.permute.xlu1 %v1583_v3  ;;  %1554 = vset.pattern.permute.xlu0 %v1583_v3  ;;  %v1318_v4 = vld [vmem:[#allocation5 + $0x8] sm:$0xff]  ;;  %v1304_v5 = vld [vmem:[#allocation4 + $0x8] sm:$0xff] }
 0x291   : > { %1321 = vperm.xlu1 %1555, %v1317_v1   ;;  %1307 = vperm.xlu0 %1554, %v1303_v2  }
 0x295   : > { %1326 = vperm.xlu1 %1555, %v1318_v4   ;;  %1312 = vperm.xlu0 %1554, %v1304_v5  }
 0x30c   : > { %v1322_v6 = vpop.permute.xlu1 %1321  ;;  %v1308_v7 = vpop.permute.xlu0 %1307 }
 0x30d   : > { %v1315_v10 = vmul.f32 %v1308_v7, %v1666_v21 }
 0x30f   : > { %v1329_v11 = vadd.f32 %v1322_v6, %v1315_v10 }
 0x310   : > { %v1313_v9 = vpop.permute.xlu0 %1312  ;;  %v1327_v12 = vpop.permute.xlu1 %1326 }
 0x311   : > { %1331 = vst [vmem:[%s1713_s5 + $0x10] sm:$0xff] %v1329_v11  ;;  %v1316_v8 = vmul.f32 %v1313_v9, %v1664_v19 }
 0x313   : > { %v1330_v13 = vadd.f32 %v1327_v12, %v1316_v8 }
 0x315   : > { %1332 = vst [vmem:[%s1713_s5 + $0x18] sm:$0xff] %v1330_v13 }
 0x316 PF: > { %s15_s20 = sadd.s32 1, %s1578_s20   ;;  %s1714_s18 = smov %s1574_s19 }
 0x317   : > { %p12_p8 = scmp.ge.s32.totalorder %s15_s20, 4   ;;  %s1715_s19 = smov %s1717_s21 }
 0x319   :  { %14 = sbr.rel (!%p12_p8) target bundleno = 2 (0x2), region = 86 }

</bundles_post_ra>
